<compile_context>
chip_gen: v7x
topology: tpu7x:2x2x1
jax: 0.10.0
libtpu: 0.0.40
codegen_flags: <defaults>
</compile_context>

<pallas_src>
import math
import functools

import jax
import jax.numpy as jnp
from jax import lax
from jax.experimental import pallas as pl
from jax.experimental.pallas import tpu as pltpu


def _layer_norm(x, gamma, beta, eps):
    mu = jnp.mean(x, axis=-1, keepdims=True)
    var = jnp.mean(jnp.square(x - mu), axis=-1, keepdims=True)
    return (x - mu) * lax.rsqrt(var + eps) * gamma + beta


def _encoder_block_kernel(valid_lens_ref,               # SMEM (B,) int32 — scalar prefetch
                          x_ref,                        # (TB, S, H)
                          wq_ref, wk_ref, wv_ref, wo_ref,   # (H, H) each, VMEM-resident
                          ln1_g_ref, ln1_b_ref,         # (1, H)
                          w1_ref, b1_ref,               # (H, F), (1, F)
                          w2_ref, b2_ref,               # (F, H), (1, H)
                          ln2_g_ref, ln2_b_ref,         # (1, H)
                          out_ref,                      # (TB, S, H)
                          attn_sc,                      # VMEM scratch (TB*S, H) f32
                          *, num_heads: int, block_rows: int, eps: float):
    TB = block_rows
    _, S, H = x_ref.shape
    d = H // num_heads
    inv_sqrt_d = 1.0 / math.sqrt(d)
    cdt = x_ref.dtype                                   # native MXU input dtype (f32 or bf16)

    # Whole (TB*S, H) slab at once: projections on the MXU, f32 accumulation, no up-casts.
    x = x_ref[...].reshape(TB * S, H)
    q = jnp.dot(x, wq_ref[...], preferred_element_type=jnp.float32)
    k = jnp.dot(x, wk_ref[...], preferred_element_type=jnp.float32)
    v = jnp.dot(x, wv_ref[...], preferred_element_type=jnp.float32)

    row0 = pl.program_id(0) * TB                        # first batch row of this block
    for t in range(TB):                                 # static, TB small
        vl = valid_lens_ref[row0 + t]                   # scalar valid length for this row
        key_mask = lax.broadcasted_iota(jnp.int32, (1, S), 1) < vl   # (1, S), bcast over queries
        rs = slice(t * S, (t + 1) * S)
        for h in range(num_heads):                      # static lane slices; result -> scratch
            cs = slice(h * d, (h + 1) * d)
            qh = q[rs, cs].astype(cdt)
            kh = k[rs, cs].astype(cdt)
            vh = v[rs, cs].astype(cdt)
            # scores = qh @ kh^T / sqrt(d) (contraction on last dims, no explicit transpose)
            s = lax.dot_general(qh, kh, (((1,), (1,)), ((), ())),
                                preferred_element_type=jnp.float32) * inv_sqrt_d
            s = jnp.where(key_mask, s, jnp.float32(-1e6))       # d2l masked_softmax fill
            m = jnp.max(s, axis=-1, keepdims=True)
            e = jnp.exp(s - m)                                  # unnormalized probabilities
            l = jnp.sum(e, axis=-1, keepdims=True)              # (S, 1) row sums
            # PV on the MXU with unnormalized weights; normalize the (S, d) output afterwards.
            o = jnp.dot(e.astype(cdt), vh, preferred_element_type=jnp.float32)
            attn_sc[rs, cs] = o * pl.reciprocal(l, approx=False)
            # (attention dropout: identity in eval mode)

    attn = attn_sc[...]                                         # (TB*S, H) f32
    y = jnp.dot(attn.astype(cdt), wo_ref[...], preferred_element_type=jnp.float32)

    # ---- AddNorm 1 (dropout identity in eval mode); LN math in f32 ----------------------
    z = _layer_norm(x.astype(jnp.float32) + y,
                    ln1_g_ref[...].astype(jnp.float32),
                    ln1_b_ref[...].astype(jnp.float32), eps)

    # ---- position-wise FFN: Linear -> LeakyReLU(0.2) -> Linear --------------------------
    h1 = jnp.dot(z.astype(cdt), w1_ref[...],
                 preferred_element_type=jnp.float32) + b1_ref[...].astype(jnp.float32)
    h1 = jnp.maximum(h1, 0.2 * h1)                              # LeakyReLU(0.2), single VPU max
    f = jnp.dot(h1.astype(cdt), w2_ref[...],
                preferred_element_type=jnp.float32) + b2_ref[...].astype(jnp.float32)

    # ---- AddNorm 2 -----------------------------------------------------------------------
    out = _layer_norm(z + f,
                      ln2_g_ref[...].astype(jnp.float32),
                      ln2_b_ref[...].astype(jnp.float32), eps)
    out_ref[...] = out.reshape(TB, S, H).astype(out_ref.dtype)


def _footprints(TB, S, H, F, x_item, w_item):
    # resident weights, double-buffered by the pipeliner
    weights = 2 * (4 * H * H + 2 * H * F + F + 5 * H) * w_item
    # x + out blocks, double-buffered
    act_blocks = 2 * 2 * TB * S * H * x_item
    # f32 intermediates: q,k,v,attn,z,y + FFN hidden + one live (S,S) score/exp pair
    interm = (6 * TB * S * H + TB * S * F) * 4 + 2 * S * S * 4
    return weights, act_blocks, interm


def _pick_block_rows(B, S, H, F, x_item, w_item, budget=24 << 20):
    divisors = [t for t in range(1, B + 1) if B % t == 0]
    fits = [t for t in divisors if sum(_footprints(t, S, H, F, x_item, w_item)) <= budget]
    if not fits:
        return 1
    # keep at least 2 grid steps when B allows (v7x has 2 TensorCores per chip)
    pref = [t for t in fits if B // t >= 2]
    return max(pref) if pref else max(fits)


def encoder_block_forward(x, valid_lens, params, *, num_heads, block_rows=None):
    """x: (B, S, H); valid_lens: (B,) int; params: dict of weights in (in, out) layout."""
    B, S, H = x.shape
    assert H % num_heads == 0
    F = params["w1"].shape[1]
    d = H // num_heads
    x_item = jnp.dtype(x.dtype).itemsize
    w_item = jnp.dtype(params["wq"].dtype).itemsize

    if block_rows is None:
        block_rows = _pick_block_rows(B, S, H, F, x_item, w_item)
    TB = int(block_rows)
    assert B % TB == 0, "block_rows must divide the batch"
    grid_b = B // TB

    # NOTE(perf): for lane-dense (unmasked) stores H should be a multiple of 128; small test
    # shapes (H=32) fall back to masked partial stores, which is correct but slower.

    # 1-D params presented as lane-dense (1, dim) rows.
    ln1_g = params["ln1_gamma"].reshape(1, H)
    ln1_b = params["ln1_beta"].reshape(1, H)
    b1 = params["b1"].reshape(1, F)
    b2 = params["b2"].reshape(1, H)
    ln2_g = params["ln2_gamma"].reshape(1, H)
    ln2_b = params["ln2_beta"].reshape(1, H)

    kernel = functools.partial(_encoder_block_kernel,
                               num_heads=num_heads, block_rows=TB, eps=1e-5)

    # Explicit VMEM budget from the real footprint (leave headroom, cap at v7x-safe 64 MiB).
    weights, act_blocks, interm = _footprints(TB, S, H, F, x_item, w_item)
    vmem_need = weights + act_blocks + interm
    vmem_limit = int(min(64 << 20, max(int(vmem_need * 1.5) + (2 << 20), 8 << 20)))

    # Advisory cost estimate for the XLA scheduler (actual itemsizes).
    flops = int(2 * B * S * H * H * 4                       # Q/K/V/O projections
                + 2 * B * num_heads * S * S * d * 2         # QK^T and PV per head
                + 2 * B * S * H * F * 2)                    # FFN dense1 + dense2
    transcendentals = int(B * num_heads * S * S + 4 * B * S)
    weight_bytes = int((4 * H * H + 2 * H * F + F + 5 * H) * w_item)
    bytes_accessed = int(2 * B * S * H * x_item + weight_bytes)

    row_map = lambda i, vl: (i, 0, 0)        # TB batch rows per grid step
    full2d = lambda i, vl: (0, 0)            # weights: same block every step (VMEM-resident)

    grid_spec = pltpu.PrefetchScalarGridSpec(
        num_scalar_prefetch=1,
        grid=(grid_b,),
        in_specs=[
            pl.BlockSpec((TB, S, H), row_map),   # x
            pl.BlockSpec((H, H), full2d),        # W_q
            pl.BlockSpec((H, H), full2d),        # W_k
            pl.BlockSpec((H, H), full2d),        # W_v
            pl.BlockSpec((H, H), full2d),        # W_o
            pl.BlockSpec((1, H), full2d),        # LN1 gamma
            pl.BlockSpec((1, H), full2d),        # LN1 beta
            pl.BlockSpec((H, F), full2d),        # FFN W1
            pl.BlockSpec((1, F), full2d),        # FFN b1
            pl.BlockSpec((F, H), full2d),        # FFN W2
            pl.BlockSpec((1, H), full2d),        # FFN b2
            pl.BlockSpec((1, H), full2d),        # LN2 gamma
            pl.BlockSpec((1, H), full2d),        # LN2 beta
        ],
        out_specs=pl.BlockSpec((TB, S, H), row_map),
        scratch_shapes=[pltpu.VMEM((TB * S, H), jnp.float32)],   # concatenated head outputs
    )

    return pl.pallas_call(
        kernel,
        out_shape=jax.ShapeDtypeStruct((B, S, H), x.dtype),
        grid_spec=grid_spec,
        compiler_params=pltpu.CompilerParams(
            # batch-row blocks are independent -> shard across v7x's two TensorCores
            dimension_semantics=("parallel",),
            vmem_limit_bytes=vmem_limit,
        ),
        cost_estimate=pl.CostEstimate(flops=flops, transcendentals=transcendentals,
                                      bytes_accessed=bytes_accessed),
    )(valid_lens.astype(jnp.int32), x,
      params["wq"], params["wk"], params["wv"], params["wo"],
      ln1_g, ln1_b, params["w1"], b1, params["w2"], b2, ln2_g, ln2_b)


# ---------------------------------- pure-JAX reference ----------------------------------
def _encoder_block_ref(x, valid_lens, params, *, num_heads, eps=1e-5):
    B, S, H = x.shape
    d = H // num_heads

    def ln(t, g, b):
        mu = t.mean(-1, keepdims=True)
        var = ((t - mu) ** 2).mean(-1, keepdims=True)
        return (t - mu) / jnp.sqrt(var + eps) * g + b

    q, k, v = x @ params["wq"], x @ params["wk"], x @ params["wv"]
    split = lambda t: t.reshape(B, S, num_heads, d).transpose(0, 2, 1, 3)
    qh, kh, vh = split(q), split(k), split(v)
    s = jnp.einsum("bhqd,bhkd->bhqk", qh, kh) / math.sqrt(d)
    mask = jnp.arange(S)[None, None, None, :] < valid_lens[:, None, None, None]
    s = jnp.where(mask, s, -1e6)
    p = jax.nn.softmax(s, axis=-1)
    o = jnp.einsum("bhqk,bhkd->bhqd", p, vh).transpose(0, 2, 1, 3).reshape(B, S, H)
    y = o @ params["wo"]
    z = ln(x + y, params["ln1_gamma"], params["ln1_beta"])
    hpre = z @ params["w1"] + params["b1"]
    hact = jnp.where(hpre > 0, hpre, 0.2 * hpre)
    f = hact @ params["w2"] + params["b2"]
    return ln(z + f, params["ln2_gamma"], params["ln2_beta"])


if __name__ == "__main__":
    # Small shapes consistent with the module: batch=2, seq=8, hidden=32, heads=4, ffn=64.
    B, S, H = 2, 8, 32
    num_heads = 4
    ffn_hidden = 64

    key = jax.random.PRNGKey(0)
    ks = jax.random.split(key, 10)
    scale = 0.1
    x = jax.random.normal(ks[0], (B, S, H), dtype=jnp.float32)
    params = dict(
        wq=scale * jax.random.normal(ks[1], (H, H), dtype=jnp.float32),
        wk=scale * jax.random.normal(ks[2], (H, H), dtype=jnp.float32),
        wv=scale * jax.random.normal(ks[3], (H, H), dtype=jnp.float32),
        wo=scale * jax.random.normal(ks[4], (H, H), dtype=jnp.float32),
        ln1_gamma=jnp.ones((H,), jnp.float32),
        ln1_beta=jnp.zeros((H,), jnp.float32),
        w1=scale * jax.random.normal(ks[5], (H, ffn_hidden), dtype=jnp.float32),
        b1=scale * jax.random.normal(ks[6], (ffn_hidden,), dtype=jnp.float32),
        w2=scale * jax.random.normal(ks[7], (ffn_hidden, H), dtype=jnp.float32),
        b2=scale * jax.random.normal(ks[8], (H,), dtype=jnp.float32),
        ln2_gamma=jnp.ones((H,), jnp.float32),
        ln2_beta=jnp.zeros((H,), jnp.float32),
    )
    valid_lens = jnp.array([8, 5], dtype=jnp.int32)

    out = encoder_block_forward(x, valid_lens, params, num_heads=num_heads)
    out = jax.block_until_ready(out)
    assert out.shape == (B, S, H)

    ref = _encoder_block_ref(x, valid_lens, params, num_heads=num_heads)
    max_err = float(jnp.max(jnp.abs(out - ref)))
    assert jnp.allclose(out, ref, atol=1e-4, rtol=1e-4), f"max abs err {max_err}"

    print("KERNEL_OK")
</pallas_src>

<mosaic_0001>
module attributes {stable_mosaic.version = 11 : i64} {
  func.func @_encoder_block_kernel(%arg0: i32, %arg1: memref<2xi32, #tpu.memory_space<smem>>, %arg2: memref<1x8x32xf32, #tpu.memory_space<vmem>>, %arg3: memref<32x32xf32, #tpu.memory_space<vmem>>, %arg4: memref<32x32xf32, #tpu.memory_space<vmem>>, %arg5: memref<32x32xf32, #tpu.memory_space<vmem>>, %arg6: memref<32x32xf32, #tpu.memory_space<vmem>>, %arg7: memref<1x32xf32, #tpu.memory_space<vmem>>, %arg8: memref<1x32xf32, #tpu.memory_space<vmem>>, %arg9: memref<32x64xf32, #tpu.memory_space<vmem>>, %arg10: memref<1x64xf32, #tpu.memory_space<vmem>>, %arg11: memref<64x32xf32, #tpu.memory_space<vmem>>, %arg12: memref<1x32xf32, #tpu.memory_space<vmem>>, %arg13: memref<1x32xf32, #tpu.memory_space<vmem>>, %arg14: memref<1x32xf32, #tpu.memory_space<vmem>>, %arg15: memref<1x8x32xf32, #tpu.memory_space<vmem>>, %arg16: memref<8x32xf32, #tpu.memory_space<vmem>>) attributes {dimension_semantics = [#tpu.dimension_semantics<parallel>], iteration_bounds = array<i64: 2>, scalar_prefetch = 1 : i64, scratch_operands = 1 : i64, tpu.core_type = #tpu.core_type<tc>, window_params = [{transform_indices = @transform_0, window_bounds = array<i64: 1, 8, 32>}, {pipeline_mode = #tpu.pipeline_mode<synchronous>, transform_indices = @transform_1, window_bounds = array<i64: 32, 32>}, {pipeline_mode = #tpu.pipeline_mode<synchronous>, transform_indices = @transform_2, window_bounds = array<i64: 32, 32>}, {pipeline_mode = #tpu.pipeline_mode<synchronous>, transform_indices = @transform_3, window_bounds = array<i64: 32, 32>}, {pipeline_mode = #tpu.pipeline_mode<synchronous>, transform_indices = @transform_4, window_bounds = array<i64: 32, 32>}, {pipeline_mode = #tpu.pipeline_mode<synchronous>, transform_indices = @transform_5, window_bounds = array<i64: 1, 32>}, {pipeline_mode = #tpu.pipeline_mode<synchronous>, transform_indices = @transform_6, window_bounds = array<i64: 1, 32>}, {pipeline_mode = #tpu.pipeline_mode<synchronous>, transform_indices = @transform_7, window_bounds = array<i64: 32, 64>}, {pipeline_mode = #tpu.pipeline_mode<synchronous>, transform_indices = @transform_8, window_bounds = array<i64: 1, 64>}, {pipeline_mode = #tpu.pipeline_mode<synchronous>, transform_indices = @transform_9, window_bounds = array<i64: 64, 32>}, {pipeline_mode = #tpu.pipeline_mode<synchronous>, transform_indices = @transform_10, window_bounds = array<i64: 1, 32>}, {pipeline_mode = #tpu.pipeline_mode<synchronous>, transform_indices = @transform_11, window_bounds = array<i64: 1, 32>}, {pipeline_mode = #tpu.pipeline_mode<synchronous>, transform_indices = @transform_12, window_bounds = array<i64: 1, 32>}, {transform_indices = @transform_13, window_bounds = array<i64: 1, 8, 32>}]} {
    %c0 = arith.constant 0 : index
    %c0_0 = arith.constant 0 : index
    %c0_1 = arith.constant 0 : index
    %0 = vector.load %arg2[%c0, %c0_0, %c0_1] : memref<1x8x32xf32, #tpu.memory_space<vmem>>, vector<1x8x32xf32>
    %1 = vector.shape_cast %0 : vector<1x8x32xf32> to vector<8x32xf32>
    %c0_2 = arith.constant 0 : index
    %c0_3 = arith.constant 0 : index
    %2 = vector.load %arg3[%c0_2, %c0_3] : memref<32x32xf32, #tpu.memory_space<vmem>>, vector<32x32xf32>
    %cst = arith.constant dense<0.000000e+00> : vector<8x32xf32>
    %3 = tpu.matmul %1, %2, %cst {dimension_numbers = #tpu.dot_dimension_numbers<[1], [0], [0], [1], [0, 0, 1, 1], [], []>} : vector<8x32xf32>, vector<32x32xf32>, vector<8x32xf32> -> vector<8x32xf32>
    %c0_4 = arith.constant 0 : index
    %c0_5 = arith.constant 0 : index
    %4 = vector.load %arg4[%c0_4, %c0_5] : memref<32x32xf32, #tpu.memory_space<vmem>>, vector<32x32xf32>
    %cst_6 = arith.constant dense<0.000000e+00> : vector<8x32xf32>
    %5 = tpu.matmul %1, %4, %cst_6 {dimension_numbers = #tpu.dot_dimension_numbers<[1], [0], [0], [1], [0, 0, 1, 1], [], []>} : vector<8x32xf32>, vector<32x32xf32>, vector<8x32xf32> -> vector<8x32xf32>
    %c0_7 = arith.constant 0 : index
    %c0_8 = arith.constant 0 : index
    %6 = vector.load %arg5[%c0_7, %c0_8] : memref<32x32xf32, #tpu.memory_space<vmem>>, vector<32x32xf32>
    %cst_9 = arith.constant dense<0.000000e+00> : vector<8x32xf32>
    %7 = tpu.matmul %1, %6, %cst_9 {dimension_numbers = #tpu.dot_dimension_numbers<[1], [0], [0], [1], [0, 0, 1, 1], [], []>} : vector<8x32xf32>, vector<32x32xf32>, vector<8x32xf32> -> vector<8x32xf32>
    %c1_i32 = arith.constant 1 : i32
    %8 = arith.muli %arg0, %c1_i32 : i32
    %c0_i32 = arith.constant 0 : i32
    %9 = arith.addi %8, %c0_i32 : i32
    %10 = arith.index_cast %9 : i32 to index
    %11 = memref.load %arg1[%10] : memref<2xi32, #tpu.memory_space<smem>>
    %12 = tpu.iota {dimensions = array<i32: 1>} : vector<1x8xi32>
    %13 = vector.broadcast %11 : i32 to vector<1x8xi32>
    %14 = arith.cmpi slt, %12, %13 : vector<1x8xi32>
    %15 = vector.extract_strided_slice %3 {offsets = [0, 0], sizes = [8, 8], strides = [1, 1]} : vector<8x32xf32> to vector<8x8xf32>
    %16 = vector.extract_strided_slice %5 {offsets = [0, 0], sizes = [8, 8], strides = [1, 1]} : vector<8x32xf32> to vector<8x8xf32>
    %17 = vector.extract_strided_slice %7 {offsets = [0, 0], sizes = [8, 8], strides = [1, 1]} : vector<8x32xf32> to vector<8x8xf32>
    %cst_10 = arith.constant dense<0.000000e+00> : vector<8x8xf32>
    %18 = tpu.matmul %15, %16, %cst_10 {dimension_numbers = #tpu.dot_dimension_numbers<[1], [1], [0], [0], [0, 0, 1, 0], [], []>} : vector<8x8xf32>, vector<8x8xf32>, vector<8x8xf32> -> vector<8x8xf32>
    %cst_11 = arith.constant 0.353553385 : f32
    %19 = vector.broadcast %cst_11 : f32 to vector<8x8xf32>
    %20 = arith.mulf %18, %19 : vector<8x8xf32>
    %cst_12 = arith.constant -1.000000e+06 : f32
    %21 = vector.shape_cast %14 : vector<1x8xi1> to vector<1x8xi1>
    %22 = vector.broadcast %21 : vector<1x8xi1> to vector<8x8xi1>
    %23 = vector.broadcast %cst_12 : f32 to vector<8x8xf32>
    %24 = arith.select %22, %20, %23 : vector<8x8xi1>, vector<8x8xf32>
    %cst_13 = arith.constant dense<0xFF800000> : vector<8xf32>
    %25 = vector.multi_reduction <maximumf>, %24, %cst_13 [1] : vector<8x8xf32> to vector<8xf32>
    %26 = vector.shape_cast %25 : vector<8xf32> to vector<8x1xf32>
    %27 = vector.broadcast %26 : vector<8x1xf32> to vector<8x8xf32>
    %28 = arith.subf %24, %27 : vector<8x8xf32>
    %29 = math.exp %28 : vector<8x8xf32>
    %cst_14 = arith.constant dense<0.000000e+00> : vector<8xf32>
    %30 = vector.multi_reduction <add>, %29, %cst_14 [1] : vector<8x8xf32> to vector<8xf32>
    %31 = vector.shape_cast %30 : vector<8xf32> to vector<8x1xf32>
    %cst_15 = arith.constant dense<0.000000e+00> : vector<8x8xf32>
    %32 = tpu.matmul %29, %17, %cst_15 {dimension_numbers = #tpu.dot_dimension_numbers<[1], [0], [0], [1], [0, 0, 1, 1], [], []>} : vector<8x8xf32>, vector<8x8xf32>, vector<8x8xf32> -> vector<8x8xf32>
    %33 = tpu.reciprocal %31 : vector<8x1xf32> -> vector<8x1xf32>
    %34 = vector.broadcast %33 : vector<8x1xf32> to vector<8x8xf32>
    %35 = arith.mulf %32, %34 : vector<8x8xf32>
    %c0_16 = arith.constant 0 : index
    %c0_17 = arith.constant 0 : index
    %36 = vector.load %arg16[%c0_16, %c0_17] : memref<8x32xf32, #tpu.memory_space<vmem>>, vector<8x8xf32>
    tpu.vector_store %arg16[%c0_16, %c0_17], %35 {strides = array<i32>} : memref<8x32xf32, #tpu.memory_space<vmem>>, vector<8x8xf32>,
    %37 = vector.extract_strided_slice %3 {offsets = [0, 8], sizes = [8, 8], strides = [1, 1]} : vector<8x32xf32> to vector<8x8xf32>
    %38 = vector.extract_strided_slice %5 {offsets = [0, 8], sizes = [8, 8], strides = [1, 1]} : vector<8x32xf32> to vector<8x8xf32>
    %39 = vector.extract_strided_slice %7 {offsets = [0, 8], sizes = [8, 8], strides = [1, 1]} : vector<8x32xf32> to vector<8x8xf32>
    %cst_18 = arith.constant dense<0.000000e+00> : vector<8x8xf32>
    %40 = tpu.matmul %37, %38, %cst_18 {dimension_numbers = #tpu.dot_dimension_numbers<[1], [1], [0], [0], [0, 0, 1, 0], [], []>} : vector<8x8xf32>, vector<8x8xf32>, vector<8x8xf32> -> vector<8x8xf32>
    %cst_19 = arith.constant 0.353553385 : f32
    %41 = vector.broadcast %cst_19 : f32 to vector<8x8xf32>
    %42 = arith.mulf %40, %41 : vector<8x8xf32>
    %cst_20 = arith.constant -1.000000e+06 : f32
    %43 = vector.shape_cast %14 : vector<1x8xi1> to vector<1x8xi1>
    %44 = vector.broadcast %43 : vector<1x8xi1> to vector<8x8xi1>
    %45 = vector.broadcast %cst_20 : f32 to vector<8x8xf32>
    %46 = arith.select %44, %42, %45 : vector<8x8xi1>, vector<8x8xf32>
    %cst_21 = arith.constant dense<0xFF800000> : vector<8xf32>
    %47 = vector.multi_reduction <maximumf>, %46, %cst_21 [1] : vector<8x8xf32> to vector<8xf32>
    %48 = vector.shape_cast %47 : vector<8xf32> to vector<8x1xf32>
    %49 = vector.broadcast %48 : vector<8x1xf32> to vector<8x8xf32>
    %50 = arith.subf %46, %49 : vector<8x8xf32>
    %51 = math.exp %50 : vector<8x8xf32>
    %cst_22 = arith.constant dense<0.000000e+00> : vector<8xf32>
    %52 = vector.multi_reduction <add>, %51, %cst_22 [1] : vector<8x8xf32> to vector<8xf32>
    %53 = vector.shape_cast %52 : vector<8xf32> to vector<8x1xf32>
    %cst_23 = arith.constant dense<0.000000e+00> : vector<8x8xf32>
    %54 = tpu.matmul %51, %39, %cst_23 {dimension_numbers = #tpu.dot_dimension_numbers<[1], [0], [0], [1], [0, 0, 1, 1], [], []>} : vector<8x8xf32>, vector<8x8xf32>, vector<8x8xf32> -> vector<8x8xf32>
    %55 = tpu.reciprocal %53 : vector<8x1xf32> -> vector<8x1xf32>
    %56 = vector.broadcast %55 : vector<8x1xf32> to vector<8x8xf32>
    %57 = arith.mulf %54, %56 : vector<8x8xf32>
    %c0_24 = arith.constant 0 : index
    %c8 = arith.constant 8 : index
    %58 = vector.load %arg16[%c0_24, %c8] : memref<8x32xf32, #tpu.memory_space<vmem>>, vector<8x8xf32>
    tpu.vector_store %arg16[%c0_24, %c8], %57 {strides = array<i32>} : memref<8x32xf32, #tpu.memory_space<vmem>>, vector<8x8xf32>,
    %59 = vector.extract_strided_slice %3 {offsets = [0, 16], sizes = [8, 8], strides = [1, 1]} : vector<8x32xf32> to vector<8x8xf32>
    %60 = vector.extract_strided_slice %5 {offsets = [0, 16], sizes = [8, 8], strides = [1, 1]} : vector<8x32xf32> to vector<8x8xf32>
    %61 = vector.extract_strided_slice %7 {offsets = [0, 16], sizes = [8, 8], strides = [1, 1]} : vector<8x32xf32> to vector<8x8xf32>
    %cst_25 = arith.constant dense<0.000000e+00> : vector<8x8xf32>
    %62 = tpu.matmul %59, %60, %cst_25 {dimension_numbers = #tpu.dot_dimension_numbers<[1], [1], [0], [0], [0, 0, 1, 0], [], []>} : vector<8x8xf32>, vector<8x8xf32>, vector<8x8xf32> -> vector<8x8xf32>
    %cst_26 = arith.constant 0.353553385 : f32
    %63 = vector.broadcast %cst_26 : f32 to vector<8x8xf32>
    %64 = arith.mulf %62, %63 : vector<8x8xf32>
    %cst_27 = arith.constant -1.000000e+06 : f32
    %65 = vector.shape_cast %14 : vector<1x8xi1> to vector<1x8xi1>
    %66 = vector.broadcast %65 : vector<1x8xi1> to vector<8x8xi1>
    %67 = vector.broadcast %cst_27 : f32 to vector<8x8xf32>
    %68 = arith.select %66, %64, %67 : vector<8x8xi1>, vector<8x8xf32>
    %cst_28 = arith.constant dense<0xFF800000> : vector<8xf32>
    %69 = vector.multi_reduction <maximumf>, %68, %cst_28 [1] : vector<8x8xf32> to vector<8xf32>
    %70 = vector.shape_cast %69 : vector<8xf32> to vector<8x1xf32>
    %71 = vector.broadcast %70 : vector<8x1xf32> to vector<8x8xf32>
    %72 = arith.subf %68, %71 : vector<8x8xf32>
    %73 = math.exp %72 : vector<8x8xf32>
    %cst_29 = arith.constant dense<0.000000e+00> : vector<8xf32>
    %74 = vector.multi_reduction <add>, %73, %cst_29 [1] : vector<8x8xf32> to vector<8xf32>
    %75 = vector.shape_cast %74 : vector<8xf32> to vector<8x1xf32>
    %cst_30 = arith.constant dense<0.000000e+00> : vector<8x8xf32>
    %76 = tpu.matmul %73, %61, %cst_30 {dimension_numbers = #tpu.dot_dimension_numbers<[1], [0], [0], [1], [0, 0, 1, 1], [], []>} : vector<8x8xf32>, vector<8x8xf32>, vector<8x8xf32> -> vector<8x8xf32>
    %77 = tpu.reciprocal %75 : vector<8x1xf32> -> vector<8x1xf32>
    %78 = vector.broadcast %77 : vector<8x1xf32> to vector<8x8xf32>
    %79 = arith.mulf %76, %78 : vector<8x8xf32>
    %c0_31 = arith.constant 0 : index
    %c16 = arith.constant 16 : index
    %80 = vector.load %arg16[%c0_31, %c16] : memref<8x32xf32, #tpu.memory_space<vmem>>, vector<8x8xf32>
    tpu.vector_store %arg16[%c0_31, %c16], %79 {strides = array<i32>} : memref<8x32xf32, #tpu.memory_space<vmem>>, vector<8x8xf32>,
    %81 = vector.extract_strided_slice %3 {offsets = [0, 24], sizes = [8, 8], strides = [1, 1]} : vector<8x32xf32> to vector<8x8xf32>
    %82 = vector.extract_strided_slice %5 {offsets = [0, 24], sizes = [8, 8], strides = [1, 1]} : vector<8x32xf32> to vector<8x8xf32>
    %83 = vector.extract_strided_slice %7 {offsets = [0, 24], sizes = [8, 8], strides = [1, 1]} : vector<8x32xf32> to vector<8x8xf32>
    %cst_32 = arith.constant dense<0.000000e+00> : vector<8x8xf32>
    %84 = tpu.matmul %81, %82, %cst_32 {dimension_numbers = #tpu.dot_dimension_numbers<[1], [1], [0], [0], [0, 0, 1, 0], [], []>} : vector<8x8xf32>, vector<8x8xf32>, vector<8x8xf32> -> vector<8x8xf32>
    %cst_33 = arith.constant 0.353553385 : f32
    %85 = vector.broadcast %cst_33 : f32 to vector<8x8xf32>
    %86 = arith.mulf %84, %85 : vector<8x8xf32>
    %cst_34 = arith.constant -1.000000e+06 : f32
    %87 = vector.shape_cast %14 : vector<1x8xi1> to vector<1x8xi1>
    %88 = vector.broadcast %87 : vector<1x8xi1> to vector<8x8xi1>
    %89 = vector.broadcast %cst_34 : f32 to vector<8x8xf32>
    %90 = arith.select %88, %86, %89 : vector<8x8xi1>, vector<8x8xf32>
    %cst_35 = arith.constant dense<0xFF800000> : vector<8xf32>
    %91 = vector.multi_reduction <maximumf>, %90, %cst_35 [1] : vector<8x8xf32> to vector<8xf32>
    %92 = vector.shape_cast %91 : vector<8xf32> to vector<8x1xf32>
    %93 = vector.broadcast %92 : vector<8x1xf32> to vector<8x8xf32>
    %94 = arith.subf %90, %93 : vector<8x8xf32>
    %95 = math.exp %94 : vector<8x8xf32>
    %cst_36 = arith.constant dense<0.000000e+00> : vector<8xf32>
    %96 = vector.multi_reduction <add>, %95, %cst_36 [1] : vector<8x8xf32> to vector<8xf32>
    %97 = vector.shape_cast %96 : vector<8xf32> to vector<8x1xf32>
    %cst_37 = arith.constant dense<0.000000e+00> : vector<8x8xf32>
    %98 = tpu.matmul %95, %83, %cst_37 {dimension_numbers = #tpu.dot_dimension_numbers<[1], [0], [0], [1], [0, 0, 1, 1], [], []>} : vector<8x8xf32>, vector<8x8xf32>, vector<8x8xf32> -> vector<8x8xf32>
    %99 = tpu.reciprocal %97 : vector<8x1xf32> -> vector<8x1xf32>
    %100 = vector.broadcast %99 : vector<8x1xf32> to vector<8x8xf32>
    %101 = arith.mulf %98, %100 : vector<8x8xf32>
    %c0_38 = arith.constant 0 : index
    %c24 = arith.constant 24 : index
    %102 = vector.load %arg16[%c0_38, %c24] : memref<8x32xf32, #tpu.memory_space<vmem>>, vector<8x8xf32>
    tpu.vector_store %arg16[%c0_38, %c24], %101 {strides = array<i32>} : memref<8x32xf32, #tpu.memory_space<vmem>>, vector<8x8xf32>,
    %c0_39 = arith.constant 0 : index
    %c0_40 = arith.constant 0 : index
    %103 = vector.load %arg16[%c0_39, %c0_40] : memref<8x32xf32, #tpu.memory_space<vmem>>, vector<8x32xf32>
    %c0_41 = arith.constant 0 : index
    %c0_42 = arith.constant 0 : index
    %104 = vector.load %arg6[%c0_41, %c0_42] : memref<32x32xf32, #tpu.memory_space<vmem>>, vector<32x32xf32>
    %cst_43 = arith.constant dense<0.000000e+00> : vector<8x32xf32>
    %105 = tpu.matmul %103, %104, %cst_43 {dimension_numbers = #tpu.dot_dimension_numbers<[1], [0], [0], [1], [0, 0, 1, 1], [], []>} : vector<8x32xf32>, vector<32x32xf32>, vector<8x32xf32> -> vector<8x32xf32>
    %106 = arith.addf %1, %105 : vector<8x32xf32>
    %c0_44 = arith.constant 0 : index
    %c0_45 = arith.constant 0 : index
    %107 = vector.load %arg7[%c0_44, %c0_45] : memref<1x32xf32, #tpu.memory_space<vmem>>, vector<1x32xf32>
    %c0_46 = arith.constant 0 : index
    %c0_47 = arith.constant 0 : index
    %108 = vector.load %arg8[%c0_46, %c0_47] : memref<1x32xf32, #tpu.memory_space<vmem>>, vector<1x32xf32>
    %cst_48 = arith.constant dense<0.000000e+00> : vector<8xf32>
    %109 = vector.multi_reduction <add>, %106, %cst_48 [1] : vector<8x32xf32> to vector<8xf32>
    %110 = vector.shape_cast %109 : vector<8xf32> to vector<8x1xf32>
    %cst_49 = arith.constant 3.200000e+01 : f32
    %111 = vector.broadcast %cst_49 : f32 to vector<8x1xf32>
    %112 = arith.divf %110, %111 : vector<8x1xf32>
    %113 = vector.broadcast %112 : vector<8x1xf32> to vector<8x32xf32>
    %114 = arith.subf %106, %113 : vector<8x32xf32>
    %115 = arith.mulf %114, %114 : vector<8x32xf32>
    %cst_50 = arith.constant dense<0.000000e+00> : vector<8xf32>
    %116 = vector.multi_reduction <add>, %115, %cst_50 [1] : vector<8x32xf32> to vector<8xf32>
    %117 = vector.shape_cast %116 : vector<8xf32> to vector<8x1xf32>
    %cst_51 = arith.constant 3.200000e+01 : f32
    %118 = vector.broadcast %cst_51 : f32 to vector<8x1xf32>
    %119 = arith.divf %117, %118 : vector<8x1xf32>
    %120 = vector.broadcast %112 : vector<8x1xf32> to vector<8x32xf32>
    %121 = arith.subf %106, %120 : vector<8x32xf32>
    %cst_52 = arith.constant 9.99999974E-6 : f32
    %122 = vector.broadcast %cst_52 : f32 to vector<8x1xf32>
    %123 = arith.addf %119, %122 : vector<8x1xf32>
    %124 = math.rsqrt %123 : vector<8x1xf32>
    %125 = vector.broadcast %124 : vector<8x1xf32> to vector<8x32xf32>
    %126 = arith.mulf %121, %125 : vector<8x32xf32>
    %127 = vector.broadcast %107 : vector<1x32xf32> to vector<8x32xf32>
    %128 = arith.mulf %126, %127 : vector<8x32xf32>
    %129 = vector.broadcast %108 : vector<1x32xf32> to vector<8x32xf32>
    %130 = arith.addf %128, %129 : vector<8x32xf32>
    %c0_53 = arith.constant 0 : index
    %c0_54 = arith.constant 0 : index
    %131 = vector.load %arg9[%c0_53, %c0_54] : memref<32x64xf32, #tpu.memory_space<vmem>>, vector<32x64xf32>
    %cst_55 = arith.constant dense<0.000000e+00> : vector<8x64xf32>
    %132 = tpu.matmul %130, %131, %cst_55 {dimension_numbers = #tpu.dot_dimension_numbers<[1], [0], [0], [1], [0, 0, 1, 1], [], []>} : vector<8x32xf32>, vector<32x64xf32>, vector<8x64xf32> -> vector<8x64xf32>
    %c0_56 = arith.constant 0 : index
    %c0_57 = arith.constant 0 : index
    %133 = vector.load %arg10[%c0_56, %c0_57] : memref<1x64xf32, #tpu.memory_space<vmem>>, vector<1x64xf32>
    %134 = vector.broadcast %133 : vector<1x64xf32> to vector<8x64xf32>
    %135 = arith.addf %132, %134 : vector<8x64xf32>
    %cst_58 = arith.constant 2.000000e-01 : f32
    %136 = vector.broadcast %cst_58 : f32 to vector<8x64xf32>
    %137 = arith.mulf %136, %135 : vector<8x64xf32>
    %138 = arith.maximumf %135, %137 : vector<8x64xf32>
    %c0_59 = arith.constant 0 : index
    %c0_60 = arith.constant 0 : index
    %139 = vector.load %arg11[%c0_59, %c0_60] : memref<64x32xf32, #tpu.memory_space<vmem>>, vector<64x32xf32>
    %cst_61 = arith.constant dense<0.000000e+00> : vector<8x32xf32>
    %140 = tpu.matmul %138, %139, %cst_61 {dimension_numbers = #tpu.dot_dimension_numbers<[1], [0], [0], [1], [0, 0, 1, 1], [], []>} : vector<8x64xf32>, vector<64x32xf32>, vector<8x32xf32> -> vector<8x32xf32>
    %c0_62 = arith.constant 0 : index
    %c0_63 = arith.constant 0 : index
    %141 = vector.load %arg12[%c0_62, %c0_63] : memref<1x32xf32, #tpu.memory_space<vmem>>, vector<1x32xf32>
    %142 = vector.broadcast %141 : vector<1x32xf32> to vector<8x32xf32>
    %143 = arith.addf %140, %142 : vector<8x32xf32>
    %144 = arith.addf %130, %143 : vector<8x32xf32>
    %c0_64 = arith.constant 0 : index
    %c0_65 = arith.constant 0 : index
    %145 = vector.load %arg13[%c0_64, %c0_65] : memref<1x32xf32, #tpu.memory_space<vmem>>, vector<1x32xf32>
    %c0_66 = arith.constant 0 : index
    %c0_67 = arith.constant 0 : index
    %146 = vector.load %arg14[%c0_66, %c0_67] : memref<1x32xf32, #tpu.memory_space<vmem>>, vector<1x32xf32>
    %cst_68 = arith.constant dense<0.000000e+00> : vector<8xf32>
    %147 = vector.multi_reduction <add>, %144, %cst_68 [1] : vector<8x32xf32> to vector<8xf32>
    %148 = vector.shape_cast %147 : vector<8xf32> to vector<8x1xf32>
    %cst_69 = arith.constant 3.200000e+01 : f32
    %149 = vector.broadcast %cst_69 : f32 to vector<8x1xf32>
    %150 = arith.divf %148, %149 : vector<8x1xf32>
    %151 = vector.broadcast %150 : vector<8x1xf32> to vector<8x32xf32>
    %152 = arith.subf %144, %151 : vector<8x32xf32>
    %153 = arith.mulf %152, %152 : vector<8x32xf32>
    %cst_70 = arith.constant dense<0.000000e+00> : vector<8xf32>
    %154 = vector.multi_reduction <add>, %153, %cst_70 [1] : vector<8x32xf32> to vector<8xf32>
    %155 = vector.shape_cast %154 : vector<8xf32> to vector<8x1xf32>
    %cst_71 = arith.constant 3.200000e+01 : f32
    %156 = vector.broadcast %cst_71 : f32 to vector<8x1xf32>
    %157 = arith.divf %155, %156 : vector<8x1xf32>
    %158 = vector.broadcast %150 : vector<8x1xf32> to vector<8x32xf32>
    %159 = arith.subf %144, %158 : vector<8x32xf32>
    %cst_72 = arith.constant 9.99999974E-6 : f32
    %160 = vector.broadcast %cst_72 : f32 to vector<8x1xf32>
    %161 = arith.addf %157, %160 : vector<8x1xf32>
    %162 = math.rsqrt %161 : vector<8x1xf32>
    %163 = vector.broadcast %162 : vector<8x1xf32> to vector<8x32xf32>
    %164 = arith.mulf %159, %163 : vector<8x32xf32>
    %165 = vector.broadcast %145 : vector<1x32xf32> to vector<8x32xf32>
    %166 = arith.mulf %164, %165 : vector<8x32xf32>
    %167 = vector.broadcast %146 : vector<1x32xf32> to vector<8x32xf32>
    %168 = arith.addf %166, %167 : vector<8x32xf32>
    %169 = vector.shape_cast %168 : vector<8x32xf32> to vector<1x8x32xf32>
    %c0_73 = arith.constant 0 : index
    %c0_74 = arith.constant 0 : index
    %c0_75 = arith.constant 0 : index
    %170 = vector.load %arg15[%c0_73, %c0_74, %c0_75] : memref<1x8x32xf32, #tpu.memory_space<vmem>>, vector<1x8x32xf32>
    tpu.vector_store %arg15[%c0_73, %c0_74, %c0_75], %169 {strides = array<i32>} : memref<1x8x32xf32, #tpu.memory_space<vmem>>, vector<1x8x32xf32>,
    return
  }
  func.func @transform_0(%arg0: i32, %arg1: memref<2xi32, #tpu.memory_space<smem>>) -> (i32, i32, i32) {
    %c0_i32 = arith.constant 0 : i32
    %c0_i32_0 = arith.constant 0 : i32
    %c0_i32_1 = arith.constant 0 : i32
    return %arg0, %c0_i32, %c0_i32_0 : i32, i32, i32
  }
  func.func @transform_1(%arg0: i32, %arg1: memref<2xi32, #tpu.memory_space<smem>>) -> (i32, i32) {
    %c0_i32 = arith.constant 0 : i32
    %c0_i32_0 = arith.constant 0 : i32
    %c0_i32_1 = arith.constant 0 : i32
    return %c0_i32, %c0_i32_0 : i32, i32
  }
  func.func @transform_2(%arg0: i32, %arg1: memref<2xi32, #tpu.memory_space<smem>>) -> (i32, i32) {
    %c0_i32 = arith.constant 0 : i32
    %c0_i32_0 = arith.constant 0 : i32
    %c0_i32_1 = arith.constant 0 : i32
    return %c0_i32, %c0_i32_0 : i32, i32
  }
  func.func @transform_3(%arg0: i32, %arg1: memref<2xi32, #tpu.memory_space<smem>>) -> (i32, i32) {
    %c0_i32 = arith.constant 0 : i32
    %c0_i32_0 = arith.constant 0 : i32
    %c0_i32_1 = arith.constant 0 : i32
    return %c0_i32, %c0_i32_0 : i32, i32
  }
  func.func @transform_4(%arg0: i32, %arg1: memref<2xi32, #tpu.memory_space<smem>>) -> (i32, i32) {
    %c0_i32 = arith.constant 0 : i32
    %c0_i32_0 = arith.constant 0 : i32
    %c0_i32_1 = arith.constant 0 : i32
    return %c0_i32, %c0_i32_0 : i32, i32
  }
  func.func @transform_5(%arg0: i32, %arg1: memref<2xi32, #tpu.memory_space<smem>>) -> (i32, i32) {
    %c0_i32 = arith.constant 0 : i32
    %c0_i32_0 = arith.constant 0 : i32
    %c0_i32_1 = arith.constant 0 : i32
    return %c0_i32, %c0_i32_0 : i32, i32
  }
  func.func @transform_6(%arg0: i32, %arg1: memref<2xi32, #tpu.memory_space<smem>>) -> (i32, i32) {
    %c0_i32 = arith.constant 0 : i32
    %c0_i32_0 = arith.constant 0 : i32
    %c0_i32_1 = arith.constant 0 : i32
    return %c0_i32, %c0_i32_0 : i32, i32
  }
  func.func @transform_7(%arg0: i32, %arg1: memref<2xi32, #tpu.memory_space<smem>>) -> (i32, i32) {
    %c0_i32 = arith.constant 0 : i32
    %c0_i32_0 = arith.constant 0 : i32
    %c0_i32_1 = arith.constant 0 : i32
    return %c0_i32, %c0_i32_0 : i32, i32
  }
  func.func @transform_8(%arg0: i32, %arg1: memref<2xi32, #tpu.memory_space<smem>>) -> (i32, i32) {
    %c0_i32 = arith.constant 0 : i32
    %c0_i32_0 = arith.constant 0 : i32
    %c0_i32_1 = arith.constant 0 : i32
    return %c0_i32, %c0_i32_0 : i32, i32
  }
  func.func @transform_9(%arg0: i32, %arg1: memref<2xi32, #tpu.memory_space<smem>>) -> (i32, i32) {
    %c0_i32 = arith.constant 0 : i32
    %c0_i32_0 = arith.constant 0 : i32
    %c0_i32_1 = arith.constant 0 : i32
    return %c0_i32, %c0_i32_0 : i32, i32
  }
  func.func @transform_10(%arg0: i32, %arg1: memref<2xi32, #tpu.memory_space<smem>>) -> (i32, i32) {
    %c0_i32 = arith.constant 0 : i32
    %c0_i32_0 = arith.constant 0 : i32
    %c0_i32_1 = arith.constant 0 : i32
    return %c0_i32, %c0_i32_0 : i32, i32
  }
  func.func @transform_11(%arg0: i32, %arg1: memref<2xi32, #tpu.memory_space<smem>>) -> (i32, i32) {
    %c0_i32 = arith.constant 0 : i32
    %c0_i32_0 = arith.constant 0 : i32
    %c0_i32_1 = arith.constant 0 : i32
    return %c0_i32, %c0_i32_0 : i32, i32
  }
  func.func @transform_12(%arg0: i32, %arg1: memref<2xi32, #tpu.memory_space<smem>>) -> (i32, i32) {
    %c0_i32 = arith.constant 0 : i32
    %c0_i32_0 = arith.constant 0 : i32
    %c0_i32_1 = arith.constant 0 : i32
    return %c0_i32, %c0_i32_0 : i32, i32
  }
  func.func @transform_13(%arg0: i32, %arg1: memref<2xi32, #tpu.memory_space<smem>>) -> (i32, i32, i32) {
    %c0_i32 = arith.constant 0 : i32
    %c0_i32_0 = arith.constant 0 : i32
    %c0_i32_1 = arith.constant 0 : i32
    return %arg0, %c0_i32, %c0_i32_0 : i32, i32, i32
  }
}

</mosaic_0001>

<bundles_post_ra>
// kernel: tpu_custom_call.1
= control target key start
LH: loop header
LB: loop body
LE: loop exit
PB: predicated region body
PF: predicated region fallthrough
CT: control target
= control target key end

     0   :  { %s2861_s0 = inlined_call_operand.hbm [shape: s32[2], index: 0, kind: input, shape index: {}]   ;;  %s2862_s1 = inlined_call_operand.hbm [shape: f32[2,8,32], index: 1, kind: input, shape index: {}]   ;;  %s2863_s2 = inlined_call_operand.vmem [shape: f32[32,32], index: 2, kind: input, shape index: {}]   ;;  %s2864_s3 = inlined_call_operand.vmem [shape: f32[32,32], index: 3, kind: input, shape index: {}]   ;;  %s2865_s4 = inlined_call_operand.vmem [shape: f32[32,32], index: 4, kind: input, shape index: {}]   ;;  %s2866_s5 = inlined_call_operand.hbm [shape: f32[32,32], index: 5, kind: input, shape index: {}]   ;;  %s2867_s6 = inlined_call_operand.vmem [shape: f32[1,32], index: 6, kind: input, shape index: {}]   ;;  %s2868_s7 = inlined_call_operand.vmem [shape: f32[1,32], index: 7, kind: input, shape index: {}]   ;;  %s2869_s8 = inlined_call_operand.hbm [shape: f32[32,64], index: 8, kind: input, shape index: {}]   ;;  %s2870_s9 = inlined_call_operand.vmem [shape: f32[1,64], index: 9, kind: input, shape index: {}]   ;;  %s2871_s10 = inlined_call_operand.vmem [shape: f32[64,32], index: 10, kind: input, shape index: {}]   ;;  %s2872_s11 = inlined_call_operand.vmem [shape: f32[1,32], index: 11, kind: input, shape index: {}]   ;;  %s2873_s12 = inlined_call_operand.vmem [shape: f32[1,32], index: 12, kind: input, shape index: {}]   ;;  %s2874_s13 = inlined_call_operand.vmem [shape: f32[1,32], index: 13, kind: input, shape index: {}]   ;;  %s2875_s14 = inlined_call_operand.hbm [shape: f32[2,8,32], index: 14, kind: output, shape index: {}]  }
   0x1   :  { %2882 = sst [smem:[#allocation18_spill]] %s2862_s1  ;;  %s2171_s15 = scalar_lea.hbm %s2861_s0, 16 }
   0x2   :  { %2883 = sst [smem:[#allocation19_spill]] %s2863_s2  ;;  %p2172_p0 = scmp.ne.s32.totalorder %s2861_s0, %s2171_s15 }
   0x3   :  { %2884 = sst [smem:[#allocation20_spill]] %s2873_s12  ;;  %p2175_p1 = scmp.lt.u32.totalorder %s2171_s15, %s2861_s0 }
   0x4   :  { %2885 = sst [smem:[#allocation21_spill]] %s2874_s13 }
   0x5   :  { %2886 = sst [smem:[#allocation22_spill]] %s2875_s14  ;;  %p2177_p2 = pnand %p2175_p1, %p2172_p0 }
   0x7   :  { %2180 = shalt.err (!%p2177_p2)  }
   0x8   :  { %s2341_s20 = smov [#allocation4]  }
   0x9   :  { %20 = dma.hbm_to_smem %s2861_s0, 16, %s2341_s20, [#allocation3] }
   0xa   :  { %2311 = dma.done.wait [#allocation3], 16 }
   0xb   :  { %2312 = vsyncadd [#allocation3], 4294967280 }
   0xc   :  { %22 = sfence }
   0xd   :  { %23 = vsyncpa [#allocation6], 0 }
   0xe   :  { %25 = vsyncpa [#allocation6 + $0x1], 0 }
   0xf   :  { %26 = vsyncpa [#allocation9], 0 }
  0x10   :  { %27 = vsyncpa [#allocation7], 0 }
  0x11   :  { %29 = vsyncpa [#allocation7 + $0x1], 0  ;;  %s2444_s23 = smov 0   ;;  %s2446_s24 = smov 0  }
  0x12   :  { %s2448_s25 = smov 0   ;;  %s2450_s26 = smov 0  }
  0x13 LB: > { %2887 = sst [smem:[#allocation16_spill]] %s2327_s23  ;;  %s2465_s0 = sadd.s32 4294967295, %s2339_s26   ;;  %s2339_s26 = sphi %s2450_s26, %s2914_s26   ;;  %s2335_s25 = sphi %s2448_s25, %s2913_s25   ;;  %s2331_s24 = sphi %s2446_s24, %s2912_s24   ;;  %s2327_s23 = sphi %s2444_s23, %s2911_s23  }
  0x14   : > { %s1826_s27 = sadd.s32 4294967294, %s2339_s26   ;;  %p55_p3 = scmp.ne.s32.totalorder %s2331_s24, %s2327_s23 }
  0x15   : > { %p2878_p4 = scmp.eq.s32.totalorder %s2465_s0, 0  ;;  %p337_p6 = scmp.eq.s32.totalorder %s1826_s27, 1 }
  0x16   : > { %p1827_p8 = scmp.ge.s32.totalorder %s2339_s26, 1  ;;  %p344_p10 = scmp.lt.s32.totalorder %s2339_s26, 3 }
  0x17   : > { %p2474_p7 = por %p2878_p4, %p55_p3  ;;  %p2479_p9 = por %p337_p6, %p55_p3 }
  0x18   : > { %p2484_p11 = pnand %p1827_p8, %p344_p10  ;;  %s2342_s15 = smov [#allocation8]  }
  0x19   : > { %s2888_s28 = scalar_select %p2474_p7, 1, 0 }
  0x1a   : > { %s2889_s29 = scalar_select %p2479_p9, 1, 0 }
  0x1b   : > { %s365_s16 = sshll.u32 %s2342_s15, 4  ;;  %p2084_p12 = pneg %p2484_p11  ;;  %s2488_s16 = int_to_ptr.vmem [resolvable:$true] %s365_s16 }
  0x1c   : > { %2890 = sst [smem:[#allocation17_spill]] %s2889_s29  ;;  %s2343_s18 = smov [#allocation10]  }
  0x1d   : > { %p2495_p0 = pnand %p2084_p12, %p2878_p4  ;;  %s384_s19 = sshll.u32 %s2343_s18, 4  ;;  %s2499_s19 = int_to_ptr.vmem [resolvable:$true] %s384_s19 }
  0x1e   : > { %s2181_s22 = scalar_lea.hbm %s2866_s5, 512 }
  0x1f   : > { %p2182_p1 = scmp.ne.s32.totalorder %s2866_s5, %s2181_s22  ;;  %p2183_p2 = pneg %p2495_p0 }
  0x20   : > { %p2188_p8 = scmp.lt.u32.totalorder %s2181_s22, %s2866_s5 }
  0x21   : > { %p2184_p3 = pnand %p2183_p2, %p2182_p1 }
  0x23   : > { %p2185_p6 = pneg %p2184_p3 }
  0x25   : > { %p2190_p10 = pnand %p2188_p8, %p2185_p6 }
  0x27   : > { %2193 = shalt.err (!%p2190_p10)
}
  0x28   : > { %s2194_s18 = scalar_lea.vmem %s2488_s16, 512  ;;  %p2202_p5 = scmp.lt.s32.totalorder %s2488_s16, %s2488_s16 }
  0x29   : > { %p2195_p12 = scmp.ne.s32.totalorder %s2488_s16, %s2194_s18  ;;  %p2203_p1 = scmp.lt.s32.totalorder %s2194_s18, %s2194_s18 }
  0x2b   : > { %p2197_p13 = pnand %p2195_p12, %p2183_p2  ;;  %p2204_p3 = por %p2203_p1, %p2202_p5 }
  0x2d   : > { %p2198_p4 = pneg %p2197_p13 }
  0x2f   : > { %p2205_p9 = pnand %p2204_p3, %p2198_p4 }
  0x31   : > { %2208 = shalt.err (!%p2205_p9)
}
  0x32   : > { %s2344_s23 = smov 128   ;;  %s2345_s29 = smov 8  }
  0x33   : > { %2087 = dma.hbm_to_vmem [thread:$0]  (!%p2495_p0), %s2866_s5, 512, %s2488_s16, [#allocation9], %s2344_s23, %s2344_s23, %s2345_s29  }
  0x34   : > { %s2209_s15 = scalar_lea.hbm %s2869_s8, 512 }
  0x35   : > { %p2210_p5 = scmp.ne.s32.totalorder %s2869_s8, %s2209_s15  ;;  %p2216_p13 = scmp.lt.u32.totalorder %s2209_s15, %s2869_s8 }
  0x37   : > { %p2212_p4 = pnand %p2210_p5, %p2183_p2 }
  0x39   : > { %p2213_p9 = pneg %p2212_p4 }
  0x3b   : > { %p2218_p6 = pnand %p2216_p13, %p2213_p9 }
  0x3d   : > { %2221 = shalt.err (!%p2218_p6)
}
  0x3e   : > { %s2222_s16 = scalar_lea.vmem %s2499_s19, 512  ;;  %p2230_p1 = scmp.lt.s32.totalorder %s2499_s19, %s2499_s19 }
  0x3f   : > { %p2223_p8 = scmp.ne.s32.totalorder %s2499_s19, %s2222_s16  ;;  %p2231_p3 = scmp.lt.s32.totalorder %s2222_s16, %s2222_s16 }
  0x41   : > { %p2225_p10 = pnand %p2223_p8, %p2183_p2  ;;  %p2232_p5 = por %p2231_p3, %p2230_p1 }
  0x43   : > { %p2226_p12 = pneg %p2225_p10 }
  0x45   : > { %p2233_p4 = pnand %p2232_p5, %p2226_p12 }
  0x47   : > { %2236 = shalt.err (!%p2233_p4)
}
  0x48   : > { %2090 = dma.hbm_to_vmem [thread:$0]  (!%p2495_p0), %s2869_s8, 512, %s2499_s19, [#allocation9], %s2344_s23, %s2344_s23, %s2345_s29  }
  0x49   : > { %s2554_s14 = sadd.s32 1, %s2339_s26   ;;  %s42_s17 = sadd.s32 1, %s2335_s25 }
  0x4a   : > { %s39_s20 = ssub.s32 %s2339_s26, %s2554_s14  ;;  %p49_p2 = scmp.ne.s32.totalorder %s2335_s25, %s2331_s24 }
  0x4b   : > { %p40_p9 = scmp.eq.s32.totalorder %s39_s20, 0  ;;  %p50_p13 = scmp.eq.s32.totalorder %s2339_s26, 0 }
  0x4c   : > { %p2893_p6 = scmp.eq.s32.totalorder %s2465_s0, 1  ;;  %p2101_p10 = scmp.lt.s32.totalorder %s2339_s26, 2 }
  0x4d   : > { %s2570_s22 = scalar_select %p40_p9, %s2335_s25, %s42_s17  }
  0x4e   : > { %p2564_p8 = por %p2893_p6, %p49_p2  ;;  %p51_p12 = por %p50_p13, %p49_p2 }
  0x4f   : > { %s413_s27 = sand.u32 1, %s2335_s25   ;;  %s1832_s19 = sshll.u32 %s2339_s26, 7 }
  0x50   : > { %s2894_s21 = scalar_select %p2564_p8, 1, 0 }
  0x51   : > { %s1831_s15 = sshll.u32 %s413_s27, 3  ;;  %s2895_s1 = sld [smem:[#allocation18_spill]] }
  0x52   : > { %s417_s16 = scalar_lea.vmem [#allocation5], %s1831_s15  ;;  %p2581_p0 = pnand %p2101_p10, %p51_p12 }
  0x53   : > { %s424_s12 = sshll.u32 %s417_s16, 4  ;;  %s414_s17 = scalar_lea.sflag [#allocation6], %s413_s27  ;;  %s2579_s12 = int_to_ptr.vmem [resolvable:$true] %s424_s12 }
  0x54   : > { %p2239_p3 = pneg %p2581_p0 }
  0x57   : > { %s2577_s18 = scalar_lea.hbm %s2895_s1, %s1832_s19  ;;  %s2242_s23 = scalar_lea.hbm %s2895_s1, 256 }
  0x58   : > { %s2237_s20 = scalar_lea.hbm %s2577_s18, 128  ;;  %p2243_p2 = scmp.lt.u32.totalorder %s2577_s18, %s2895_s1 }
  0x59   : > { %p2238_p1 = scmp.ne.s32.totalorder %s2577_s18, %s2237_s20  ;;  %p2244_p9 = scmp.lt.u32.totalorder %s2242_s23, %s2237_s20 }
  0x5a   : > { %p2246_p6 = scmp.lt.u32.totalorder %s2237_s20, %s2577_s18 }
  0x5b   : > { %p2240_p5 = pnand %p2239_p3, %p2238_p1  ;;  %p2245_p13 = por %p2244_p9, %p2243_p2 }
  0x5d   : > { %p2241_p4 = pneg %p2240_p5  ;;  %p2247_p10 = por %p2246_p6, %p2245_p13 }
  0x5f   : > { %p2248_p12 = pnand %p2247_p10, %p2241_p4 }
  0x61   : > { %2251 = shalt.err (!%p2248_p12)
}
  0x62   : > { %s2252_s27 = scalar_lea.vmem %s2579_s12, 128  ;;  %s2346_s19 = smov [#allocation5]  }
  0x63   : > { %p2253_p1 = scmp.ne.s32.totalorder %s2579_s12, %s2252_s27  ;;  %s2257_s15 = sshll.u32 %s2346_s19, 4  ;;  %s2258_s15 = int_to_ptr.vmem [resolvable:$false] %s2257_s15 }
  0x64   : > { %s2259_s29 = scalar_lea.vmem %s2258_s15, 256  ;;  %p2260_p7 = scmp.lt.s32.totalorder %s2579_s12, %s2258_s15 }
  0x65   : > { %p2255_p5 = pnand %p2253_p1, %p2239_p3  ;;  %p2261_p2 = scmp.lt.s32.totalorder %s2259_s29, %s2252_s27 }
  0x67   : > { %p2256_p8 = pneg %p2255_p5  ;;  %p2262_p9 = por %p2261_p2, %p2260_p7 }
  0x69   : > { %p2263_p13 = pnand %p2262_p9, %p2256_p8 }
  0x6b   : > { %2266 = shalt.err (!%p2263_p13)
}
  0x6c   : > { %2094 = dma.hbm_to_vmem [thread:$0]  (!%p2581_p0), %s2577_s18, 128, %s2579_s12, %s414_s17  }
  0x6d   : > { %433 = sbr.rel (%p2484_p11) target bundleno = 2482 (0x9b2), region = 72  ;;  %s2613_s20 = sand.u32 (!%p2484_p11), 1, %s2331_s24  }
  0x6e   : > { %s1834_s23 = sshll.u32 (!%p2484_p11), %s2613_s20, 3  ;;  %s436_s16 = scalar_lea.sflag (!%p2484_p11), [#allocation6], %s2613_s20 }
  0x6f   : > { %s439_s27 = scalar_lea.vmem (!%p2484_p11), [#allocation5], %s1834_s23  ;;  %p2897_p7 = scmp.ne.s32.totalorder (!%p2484_p11), %s2888_s28, 0 }
  0x74   : > { %2314 = dma.done.wait (%p2897_p7), %s436_s16, 128  }
  0x75   : > { %2316 = vsyncadd (%p2897_p7), %s436_s16, 4294967168  ;;  %p2898_p8 = scmp.eq.s32.totalorder %s2465_s0, 0 }
  0x77   : > { %2318 = dma.done.wait (%p2898_p8), [#allocation9], 1024   ;;  %p2899_p11 = pmov %p2898_p8 }
  0x78   : > { %v2347_v0 = vmov 0.0|0.0   ;;  %vm2348_vm0 = vmmov 0   ;;  %v2349_v1 = vmov 0.0   ;;  %s2900_s2 = sld [smem:[#allocation19_spill]]  ;;  %v569_v8 = vld [vmem:[%s2864_s3] sm:$0xff]  ;;  %v570_v9 = vld [vmem:[%s2864_s3 + $0x8] sm:$0xff]  ;;  %v718_v33 = vlaneseq }
  0x79   : > { %2320 = vsyncadd (%p2899_p11), [#allocation9], 4294966272  ;;  %2030 = vmatprep.subr.bf16.mxu1 %v2347_v0  ;;  %1924 = vmatprep.mubr.msk.f32.mxu1 %vm2348_vm0, %v2349_v1  ;;  %v2652_v10 = vld [vmem:[%s439_s27] sm:$0xff]  ;;  %vm495_vm1 = vcmask 261120   ;;  %v2037_v11 = vpack.c.bf16 %v570_v9, %v569_v8  ;;  %v572_v13 = vld [vmem:[%s2864_s3 + $0x18] sm:$0xff]  ;;  %vm722_vm2 = vcmask 64512  }
  0x7a   : > { %2042 = vmatprep.subr.bf16.mxu0 %v2347_v0  ;;  %1946 = vmatprep.mubr.msk.f32.mxu0 %vm2348_vm0, %v2349_v1  ;;  %v571_v12 = vld [vmem:[%s2864_s3 + $0x10] sm:$0xff]  ;;  %v643_v15 = vld [vmem:[%s2865_s4] sm:$0xff]  ;;  %v644_v16 = vld [vmem:[%s2865_s4 + $0x8] sm:$0xff]  ;;  %s2350_s12 = smov 112   ;;  %s2351_s13 = smov 120   ;;  %v719_v34 = vand.u32 127, %v718_v33 }
  0x7b   : > { %v2040_v14 = vpack.c.bf16 %v572_v13, %v571_v12  ;;  %v645_v17 = vld [vmem:[%s2865_s4 + $0x10] sm:$0xff]  ;;  %v2043_v18 = vpack.c.bf16 %v644_v16, %v643_v15  ;;  %v646_v19 = vld [vmem:[%s2865_s4 + $0x18] sm:$0xff]  ;;  %s2352_s17 = smov 104   ;;  %s717_s27 = sld [smem:[#allocation4 + %s2465_s0]]  ;;  %vm1060_vm4 = vcmask 130112   ;;  %vm1233_vm5 = vcmask 195712  }
  0x7c   : > { %v2046_v20 = vpack.c.bf16 %v646_v19, %v645_v17  ;;  %s2353_s19 = smov 8   ;;  %s2354_s15 = smov 16   ;;  %vm1406_vm6 = vcmask 261312   ;;  %vm1618_vm7 = vcmask 523264  }
  0x7d   : > { %2044 = vmatpush3.bf16.msra.mxu0 %v2043_v18  ;;  %s2355_s29 = smov 24   ;;  %s2905_s1 = sld [smem:[#allocation22_spill]] }
  0x7e   : > { %v491_v2 = vld [vmem:[%s2900_s2] sm:$0xff]  ;;  %v492_v3 = vld [vmem:[%s2900_s2 + $0x8] sm:$0xff]  ;;  %v493_v4 = vld [vmem:[%s2900_s2 + $0x10] sm:$0xff]  ;;  %2045 = vmatprep.subr.bf16.mxu0 %v2347_v0  ;;  %s1724_s30 = scalar_lea.sflag [#allocation7], %s2613_s20  ;;  %p2906_p3 = scmp.ne.s32.totalorder %s2894_s21, 0 }
  0x7f   : > { %v2031_v5 = vpack.c.bf16 %v492_v3, %v491_v2  ;;  %v494_v6 = vld [vmem:[%s2900_s2 + $0x18] sm:$0xff] }
  0x80   : > { %v2034_v7 = vpack.c.bf16 %v494_v6, %v493_v4 }
  0x81   : > { %2032 = vmatpush3.bf16.msra.mxu1 %v2031_v5  ;;  %2047 = vmatpush3.bf16.msra.mxu0 %v2046_v20  ;;  %v720_v35 = vstv %s717_s27  ;;  %s2904_s27 = sld [smem:[#allocation21_spill]] }
  0x82   : > { %2033 = vmatprep.subr.bf16.mxu1 %v2347_v0  ;;  %1959 = vmatprep.subr.mxu0 %v2349_v1  ;;  %vm2715_vm3 = vcmp.lt.s32.totalorder %v719_v34, %v720_v35 }
  0x84   : > { %1947 = vmatmul.mubr.msk.f32.vlgmr.msra.gmra.mrb[0].mxu0 %vm495_vm1, %v2652_v10 }
  0x85   : > { %2035 = vmatpush3.bf16.msra.mxu1 %v2034_v7  ;;  %1961 = vmatprep.mubr.msk.f32.mxu0 %vm2348_vm0, %v2349_v1 }
  0x86   : > { %2036 = vmatprep.subr.bf16.mxu1 %v2347_v0 }
  0x88   : > { %1925 = vmatmul.mubr.msk.f32.vlgmr.msra.gmra.mrb[0].mxu1 %vm495_vm1, %v2652_v10 }
  0x89   : > { %2038 = vmatpush3.bf16.msra.mxu1 %v2037_v11  ;;  %1935 = vmatprep.mubr.msk.f32.mxu1 %vm2348_vm0, %v2349_v1 }
  0x8a   : > { %2039 = vmatprep.subr.bf16.mxu1 %v2347_v0 }
  0x8d   : > { %2041 = vmatpush3.bf16.msra.mxu1 %v2040_v14 }
  0x8e   : > { %1949 = vmatprep.subr.mxu1 %v2349_v1 }
  0x90   : > { %1936 = vmatmul.mubr.msk.f32.vlgmr.msra.gmra.mrb[2].mxu1 %vm495_vm1, %v2652_v10 }
  0x91   : > { %1951 = vmatprep.mubr.msk.f32.mxu1 %vm2348_vm0, %v2349_v1 }
 0x157   : > { %v713_v25 = vpop.f32.mrb[0].mxu0 }
 0x158   : > { %v1948_v26 = vpop.f32.mrb[1].mxu0 }
 0x15b   : > { %v565_v21 = vpop.f32.mrb[0].mxu1 }
 0x15c   : > { %v1926_v22 = vpop.f32.mrb[1].mxu1 }
 0x163   : > { %v639_v23 = vpop.f32.mrb[2].mxu1 }
 0x164   : > { %1064 = vrot.lane.b32.xlu1 %v639_v23, %s2350_s12  ;;  %890 = vrot.lane.b32.xlu0 %v639_v23, %s2351_s13  ;;  %v1937_v24 = vpop.f32.mrb[3].mxu1 }
 0x165   : > { %1950 = vmatpush3.xpose.msk.msra.mxu1 %vm722_vm2, %v639_v23 }
 0x166   : > { %1954 = vmatprep.subr.mxu1 %v2349_v1 }
 0x168   : > { %1952 = vmatmul.mubr.msk.f32.vlgmr.msra.gmra.mrb[4].mxu1 %vm722_vm2, %v565_v21  ;;  %1062 = vrot.lane.b32.xlu1 %v565_v21, %s2350_s12 }
 0x169   : > { %888 = vrot.lane.b32.xlu0 %v565_v21, %s2351_s13  ;;  %1956 = vmatprep.mubr.msk.f32.mxu1 %vm2348_vm0, %v2349_v1 }
 0x16a   : > { %1955 = vmatpush3.msra.mxu1 %v713_v25 }
 0x16b   : > { %1964 = vmatprep.subr.mxu1 %v2349_v1 }
 0x16c   : > { %1235 = vrot.lane.b32.xlu1 %v565_v21, %s2352_s17 }
 0x16d   : > { %1237 = vrot.lane.b32.xlu0 %v639_v23, %s2352_s17 }
 0x170   : > { %978 = vrot.lane.b32.xlu1 %v713_v25, %s2351_s13 }
 0x1d6   : > { %v891_v27 = vpop.permute.xlu0 %890  ;;  %v1065_v28 = vpop.permute.xlu1 %1064 }
 0x1d7   : > { %1960 = vmatpush3.xpose.msk.msra.mxu0 %vm722_vm2, %v891_v27  ;;  %v1409_v27 = vld [vmem:[#allocation8] sm:$0xff] }
 0x1d8   : > { %1969 = vmatprep.subr.mxu0 %v2349_v1 }
 0x1da   : > { %v1063_v30 = vpop.permute.xlu1 %1062 }
 0x1db   : > { %v889_v29 = vpop.permute.xlu0 %888 }
 0x1dc   : > { %1962 = vmatmul.mubr.msk.f32.vlgmr.msra.gmra.mrb[2].mxu0 %vm722_vm2, %v889_v29 }
 0x1dd   : > { %1970 = vmatpush3.xpose.msk.msra.mxu0 %vm722_vm2, %v1065_v28  ;;  %1971 = vmatprep.mubr.msk.f32.mxu0 %vm2348_vm0, %v2349_v1  ;;  %v1410_v28 = vld [vmem:[#allocation8 + $0x8] sm:$0xff] }
 0x1de   : > { %1979 = vmatprep.subr.mxu0 %v2349_v1  ;;  %v1236_v32 = vpop.permute.xlu1 %1235  ;;  %v2049_v29 = vpack.c.bf16 %v1410_v28, %v1409_v27  ;;  %v1858_v27 = vld [vmem:[%s2872_s11] ss:$0 sm:$0xff] }
 0x1df   : > { %v1238_v31 = vpop.permute.xlu0 %1237 }
 0x1e0   : > { %1972 = vmatmul.mubr.msk.f32.vlgmr.msra.gmra.mrb[4].mxu0 %vm722_vm2, %v1063_v30  ;;  %v1411_v30 = vld [vmem:[#allocation8 + $0x10] sm:$0xff] }
 0x1e1   : > { %1980 = vmatpush3.xpose.msk.msra.mxu0 %vm722_vm2, %v1238_v31  ;;  %1981 = vmatprep.mubr.msk.f32.mxu0 %vm2348_vm0, %v2349_v1  ;;  %v1412_v31 = vld [vmem:[#allocation8 + $0x18] sm:$0xff] }
 0x1e2   : > { %2048 = vmatprep.subr.bf16.mxu0 %v2347_v0  ;;  %v979_v60 = vpop.permute.xlu1 %978  ;;  %v2052_v34 = vpack.c.bf16 %v1412_v31, %v1411_v30 }
 0x1e4   : > { %1982 = vmatmul.mubr.msk.f32.vlgmr.msra.gmra.mrb[6].mxu0 %vm722_vm2, %v1236_v32 }
 0x1e5   : > { %1997 = vmatprep.mubr.msk.f32.mxu0 %vm2348_vm0, %v2349_v1  ;;  %2050 = vmatpush3.bf16.msra.mxu0 %v2049_v29 }
 0x1e6   : > { %2051 = vmatprep.subr.bf16.mxu0 %v2347_v0 }
 0x1e9   : > { %2053 = vmatpush3.bf16.msra.mxu0 %v2052_v34 }
 0x1ea   : > { %2060 = vmatprep.subr.bf16.mxu0 %v2347_v0 }
 0x23b   : > { %v795_v36 = vpop.f32.mrb[4].mxu1 }
 0x23c   : > { %v799_v38 = vmul.f32 0.35355338, %v795_v36  ;;  %v1953_v39 = vpop.f32.mrb[5].mxu1 }
 0x23e   : > { %v802_v40 = vsel %vm2715_vm3, %v799_v38, -1000000.0 }
 0x23f   : > { %v803_v41 = vsel %vm722_vm2, %v802_v40, -inf }
 0x240   : > { %804 = vmax.xlane.f32.xlu0 %v803_v41 }
 0x2af   : > { %v962_v42 = vpop.f32.mrb[2].mxu0 }
 0x2b0   : > { %v966_v43 = vmul.f32 0.35355338, %v962_v42  ;;  %v1963_v44 = vpop.f32.mrb[3].mxu0 }
 0x2b2   : > { %v967_v45 = vsel %vm2715_vm3, %v966_v43, -1000000.0 }
 0x2b3   : > { %v1136_v46 = vpop.f32.mrb[4].mxu0  ;;  %v968_v47 = vsel %vm722_vm2, %v967_v45, -inf }
 0x2b4   : > { %v1140_v48 = vmul.f32 0.35355338, %v1136_v46  ;;  %969 = vmax.xlane.f32.xlu1 %v968_v47  ;;  %v1973_v49 = vpop.f32.mrb[5].mxu0 }
 0x2b6   : > { %v1141_v50 = vsel %vm2715_vm3, %v1140_v48, -1000000.0 }
 0x2b7   : > { %v1309_v51 = vpop.f32.mrb[6].mxu0  ;;  %v1142_v52 = vsel %vm722_vm2, %v1141_v50, -inf }
 0x2b8   : > { %v1313_v53 = vmul.f32 0.35355338, %v1309_v51  ;;  %v1983_v54 = vpop.f32.mrb[7].mxu0  ;;  %1143 = vmax.xlane.f32.xlu0 %v1142_v52 }
 0x2ba   : > { %v1314_v55 = vsel %vm2715_vm3, %v1313_v53, -1000000.0 }
 0x2bb   : > { %v1315_v56 = vsel %vm722_vm2, %v1314_v55, -inf }
 0x2bc   : > { %1316 = vmax.xlane.f32.xlu0 %v1315_v56 }
 0x2c5   : > { %1324 = vrot.lane.b32.xlu1 %v713_v25, %s2352_s17 }
 0x2cd   : > { %v805_v57 = vpop.xlane.xlu0 %804 }
 0x2ce   : > { %v806_v58 = vsub.f32 %v802_v40, %v805_v57 }
 0x2d0   : > { %v807_v59 = vmul.f32 1.442695, %v806_v58  ;;  %v1517_v58 = vld [vmem:[#allocation10] sm:$0xff] }
 0x2d2   : > { %2151 = vpow2.f32 %v807_v59  ;;  %1151 = vrot.lane.b32.xlu0 %v713_v25, %s2350_s12  ;;  %v1518_v59 = vld [vmem:[#allocation10 + $0x8] sm:$0xff]  ;;  %s2903_s12 = sld [smem:[#allocation20_spill]] }
 0x2dc   : > { %v2152_v61 = vpop.eup %2151 }
 0x2dd   : > { %1957 = vmatmul.mubr.msk.f32.vlgmr.msra.gmra.mrb[6].mxu1 %vm722_vm2, %v2152_v61  ;;  %v809_v15 = vsel %vm722_vm2, %v2152_v61, 0.0  ;;  %v1520_v61 = vld [vmem:[#allocation10 + $0x18] sm:$0xff] }
 0x2de   : > { %1965 = vmatpush3.msra.mxu1 %v979_v60  ;;  %1966 = vmatprep.mubr.msk.f32.mxu1 %vm2348_vm0, %v2349_v1  ;;  %v2055_v60 = vpack.c.bf16 %v1518_v59, %v1517_v58 }
 0x2df   : > { %1974 = vmatprep.subr.mxu1 %v2349_v1 }
 0x341   : > { %v970_v62 = vpop.xlane.xlu1 %969 }
 0x342   : > { %v971_v63 = vsub.f32 %v967_v45, %v970_v62  ;;  %v1603_v62 = vld [vmem:[%s2871_s10] sm:$0xff] }
 0x344   : > { %v972_v2 = vmul.f32 1.442695, %v971_v63  ;;  %v1604_v63 = vld [vmem:[%s2871_s10 + $0x8] sm:$0xff] }
 0x345   : > { %v1144_v3 = vpop.xlane.xlu0 %1143  ;;  %v1325_v14 = vpop.permute.xlu1 %1324 }
 0x346   : > { %2153 = vpow2.f32 %v972_v2  ;;  %v1145_v4 = vsub.f32 %v1141_v50, %v1144_v3  ;;  %v1605_v2 = vld [vmem:[%s2871_s10 + $0x10] sm:$0xff]  ;;  %v2061_v3 = vpack.c.bf16 %v1604_v63, %v1603_v62 }
 0x348   : > { %v1146_v5 = vmul.f32 1.442695, %v1145_v4  ;;  %v1606_v4 = vld [vmem:[%s2871_s10 + $0x18] sm:$0xff] }
 0x349   : > { %v1317_v6 = vpop.xlane.xlu0 %1316 }
 0x34a   : > { %2155 = vpow2.f32 %v1146_v5  ;;  %v1318_v7 = vsub.f32 %v1314_v55, %v1317_v6  ;;  %v2064_v5 = vpack.c.bf16 %v1606_v4, %v1605_v2 }
 0x34c   : > { %v1319_v8 = vmul.f32 1.442695, %v1318_v7 }
 0x34d   : > { %v1152_v11 = vpop.permute.xlu0 %1151 }
 0x34e   : > { %2157 = vpow2.f32 %v1319_v8 }
 0x350   : > { %v2154_v9 = vpop.eup %2153 }
 0x351   : > { %1967 = vmatmul.mubr.msk.f32.vlgmr.msra.gmra.mrb[8].mxu1 %vm722_vm2, %v2154_v9  ;;  %v974_v12 = vsel %vm722_vm2, %v2154_v9, 0.0 }
 0x352   : > { %1975 = vmatpush3.msra.mxu1 %v1152_v11  ;;  %975 = vadd.xlane.f32.xlu1 %v974_v12  ;;  %v1854_v11 = vld [vmem:[%s2867_s6] ss:$0 sm:$0xff] }
 0x353   : > { %1976 = vmatprep.mubr.msk.f32.mxu1 %vm2348_vm0, %v2349_v1  ;;  %1984 = vmatprep.subr.mxu1 %v2349_v1 }
 0x354   : > { %v2156_v13 = vpop.eup %2155 }
 0x355   : > { %1977 = vmatmul.mubr.msk.f32.vlgmr.msra.gmra.mrb[10].mxu1 %vm722_vm2, %v2156_v13  ;;  %v1148_v16 = vsel %vm722_vm2, %v2156_v13, 0.0  ;;  %v1855_v13 = vld [vmem:[%s2868_s7] ss:$0 sm:$0xff] }
 0x356   : > { %1985 = vmatpush3.msra.mxu1 %v1325_v14  ;;  %810 = vadd.xlane.f32.xlu1 %v809_v15 }
 0x357   : > { %1149 = vadd.xlane.f32.xlu0 %v1148_v16  ;;  %1986 = vmatprep.mubr.msk.f32.mxu1 %vm2348_vm0, %v2349_v1  ;;  %v1607_v16 = vld [vmem:[%s2871_s10 + $0x20] sm:$0xff] }
 0x358   : > { %v2158_v17 = vpop.eup %2157  ;;  %2054 = vmatprep.subr.bf16.mxu1 %v2347_v0 }
 0x359   : > { %1987 = vmatmul.mubr.msk.f32.vlgmr.msra.gmra.mrb[12].mxu1 %vm722_vm2, %v2158_v17  ;;  %v1321_v18 = vsel %vm722_vm2, %v2158_v17, 0.0  ;;  %v1608_v17 = vld [vmem:[%s2871_s10 + $0x28] sm:$0xff] }
 0x35a   : > { %2008 = vmatprep.mubr.msk.f32.mxu1 %vm2348_vm0, %v2349_v1  ;;  %2056 = vmatpush3.bf16.msra.mxu1 %v2055_v60 }
 0x35b   : > { %1322 = vadd.xlane.f32.xlu0 %v1321_v18  ;;  %2057 = vmatprep.subr.bf16.mxu1 %v2347_v0  ;;  %v2067_v18 = vpack.c.bf16 %v1608_v17, %v1607_v16 }
 0x3b0   : > { %v881_v19 = vpop.f32.mrb[6].mxu1 }
 0x3b1   : > { %v1958_v20 = vpop.f32.mrb[7].mxu1 }
 0x3b2   : > { %v1610_v20 = vld [vmem:[%s2871_s10 + $0x38] sm:$0xff] }
 0x3df   : > { %v976_v21 = vpop.xlane.xlu1 %975 }
 0x3e3   : > { %v811_v22 = vpop.xlane.xlu1 %810 }
 0x3e4   : > { %2159 = vrcp.f32 %v811_v22  ;;  %v1150_v25 = vpop.xlane.xlu0 %1149  ;;  %v1856_v22 = vld [vmem:[%s2870_s9] ss:$0 sm:$0xff] }
 0x3e5   : > { %2161 = vrcp.f32 %v976_v21 }
 0x3e6   : > { %2163 = vrcp.f32 %v1150_v25 }
 0x3e8   : > { %v1323_v26 = vpop.xlane.xlu0 %1322 }
 0x3e9   : > { %2165 = vrcp.f32 %v1323_v26 }
 0x3ee   : > { %v2160_v23 = vpop.eup %2159 }
 0x3ef   : > { %v886_v24 = vmul.f32 %v2160_v23, %v881_v19  ;;  %v2162_v32 = vpop.eup %2161  ;;  %v1609_v19 = vld [vmem:[%s2871_s10 + $0x30] sm:$0xff] }
 0x3f0   : > { %v2164_v37 = vpop.eup %2163  ;;  %v2070_v21 = vpack.c.bf16 %v1610_v20, %v1609_v19 }
 0x3f1   : > { %887 = vst.msk [vmem:[#allocation2] sm:$0xff] %vm722_vm2, %v886_v24 }
 0x3f3   : > { %v2166_v41 = vpop.eup %2165 }
 0x424   : > { %v1050_v33 = vpop.f32.mrb[8].mxu1 }
 0x425   : > { %v1055_v35 = vmul.f32 %v2162_v32, %v1050_v33  ;;  %v1968_v36 = vpop.f32.mrb[9].mxu1 }
 0x427   : > { %1057 = vrot.lane.b32.xlu0 %v1055_v35, %s2353_s19  ;;  %s1863_s19 = sshll.u32 %s2465_s0, 7  ;;  %s2356_s0 = smov [#allocation11]  }
 0x428   : > { %v1223_v38 = vpop.f32.mrb[10].mxu1  ;;  %s2816_s2 = scalar_lea.hbm %s2905_s1, %s1863_s19 }
 0x429   : > { %v1228_v39 = vmul.f32 %v2164_v37, %v1223_v38  ;;  %v1978_v40 = vpop.f32.mrb[11].mxu1 }
 0x42b   : > { %1230 = vrot.lane.b32.xlu1 %v1228_v39, %s2354_s15  ;;  %s489_s15 = scalar_lea.vmem [#allocation11], %s1834_s23  ;;  %s2271_s23 = sshll.u32 %s2356_s0, 4  ;;  %s2272_s23 = int_to_ptr.vmem [resolvable:$false] %s2271_s23 }
 0x42c   : > { %v1396_v42 = vpop.f32.mrb[12].mxu1 }
 0x42d   : > { %v1401_v43 = vmul.f32 %v2166_v41, %v1396_v42  ;;  %v1988_v44 = vpop.f32.mrb[13].mxu1  ;;  %v1860_v42 = vld [vmem:[%s2903_s12] ss:$0 sm:$0xff]  ;;  %s2273_s12 = scalar_lea.vmem %s2272_s23, 256 }
 0x42e   : > { %v1861_v44 = vld [vmem:[%s2904_s27] ss:$0 sm:$0xff] }
 0x42f   : > { %1403 = vrot.lane.b32.xlu1 %v1401_v43, %s2355_s29  ;;  %s1737_s29 = sshll.u32 %s489_s15, 4  ;;  %s2818_s29 = int_to_ptr.vmem [resolvable:$true] %s1737_s29 }
 0x430   : > { %s2267_s18 = scalar_lea.vmem %s2818_s29, 128  ;;  %p2274_p10 = scmp.lt.s32.totalorder %s2818_s29, %s2272_s23 }
 0x431   : > { %p2268_p0 = scmp.ne.s32.totalorder %s2818_s29, %s2267_s18  ;;  %p2275_p12 = scmp.lt.s32.totalorder %s2273_s12, %s2267_s18 }
 0x433   : > { %p2269_p4 = pnand %p2268_p0, %p2906_p3  ;;  %p2276_p1 = por %p2275_p12, %p2274_p10 }
 0x435   : > { %p2270_p6 = pneg %p2269_p4 }
 0x437   : > { %p2277_p5 = pnand %p2276_p1, %p2270_p6 }
 0x499   : > { %v1058_v45 = vpop.permute.xlu0 %1057 }
 0x49a   : > { %1061 = vst.msk [vmem:[#allocation2] sm:$0xff] %vm1060_vm4, %v1058_v45 }
 0x49d   : > { %v1231_v46 = vpop.permute.xlu1 %1230 }
 0x49e   : > { %1234 = vst.msk [vmem:[#allocation2] sm:$0xff] %vm1233_vm5, %v1231_v46 }
 0x4a1   : > { %v1404_v47 = vpop.permute.xlu1 %1403 }
 0x4a2   : > { %1407 = vst.msk [vmem:[#allocation2] sm:$0xff] %vm1406_vm6, %v1404_v47 }
 0x4a9   : > { %v1408_v48 = vld [vmem:[#allocation2] sm:$0xff] }
 0x4aa   : > { %1998 = vmatmul.mubr.msk.f32.vlgmr.msra.gmra.mrb[8].mxu0 %vm495_vm1, %v1408_v48 }
 0x4ab   : > { %2027 = vmatprep.mubr.msk.f32.mxu0 %vm2348_vm0, %v2349_v1  ;;  %v1519_v1 = vld [vmem:[#allocation10 + $0x10] sm:$0xff]  ;;  %2062 = vmatpush3.bf16.msra.mxu0 %v2061_v3 }
 0x4ac   : > { %2063 = vmatprep.subr.bf16.mxu0 %v2347_v0 }
 0x4af   : > { %2065 = vmatpush3.bf16.msra.mxu0 %v2064_v5 }
 0x4b0   : > { %2066 = vmatprep.subr.bf16.mxu0 %v2347_v0 }
 0x4b3   : > { %2068 = vmatpush3.bf16.msra.mxu0 %v2067_v18 }
 0x4b4   : > { %2069 = vmatprep.subr.bf16.mxu0 %v2347_v0 }
 0x4b7   : > { %2071 = vmatpush3.bf16.msra.mxu0 %v2070_v21 }
 0x57d   : > { %v1482_v49 = vpop.f32.mrb[8].mxu0 }
 0x57e   : > { %v1486_v50 = vadd.f32 %v1482_v49, %v2652_v10  ;;  %v1999_v51 = vpop.f32.mrb[9].mxu0  ;;  %v2058_v10 = vpack.c.bf16 %v1520_v61, %v1519_v1 }
 0x580   : > { %v1489_v52 = vsel %vm495_vm1, %v1486_v50, 0.0  ;;  %2059 = vmatpush3.bf16.msra.mxu1 %v2058_v10 }
 0x581   : > { %1490 = vadd.xlane.f32.xlu0 %v1489_v52 }
 0x60e   : > { %v1491_v53 = vpop.xlane.xlu0 %1490 }
 0x60f   : > { %v1493_v54 = vmul.f32 0.03125, %v1491_v53 }
 0x611   : > { %v1494_v55 = vsub.f32 %v1486_v50, %v1493_v54 }
 0x613   : > { %v1495_v56 = vmul.f32 %v1494_v55, %v1494_v55 }
 0x615   : > { %v1496_v57 = vsel %vm495_vm1, %v1495_v56, 0.0 }
 0x616   : > { %1497 = vadd.xlane.f32.xlu1 %v1496_v57 }
 0x6a3   : > { %v1498_v6 = vpop.xlane.xlu1 %1497 }
 0x6a4   : > { %v1499_v7 = vmul.f32 0.03125, %v1498_v6 }
 0x6a6   : > { %v1500_v8 = vadd.f32 1e-05, %v1499_v7 }
 0x6a8   : > { %2167 = vrsqrt.f32 %v1500_v8 }
 0x6b2   : > { %v2168_v9 = vpop.eup %2167 }
 0x6b3   : > { %v1502_v12 = vmul.f32 %v2168_v9, %v1494_v55 }
 0x6b5   : > { %v1509_v14 = vmul.f32 %v1854_v11, %v1502_v12 }
 0x6b7   : > { %v1516_v15 = vadd.f32 %v1855_v13, %v1509_v14 }
 0x6b9   : > { %2009 = vmatmul.mubr.msk.f32.vlgmr.msra.gmra.mrb[14].mxu1 %vm495_vm1, %v1516_v15 }
 0x78c   : > { %v1597_v23 = vpop.f32.mrb[14].mxu1 }
 0x78d   : > { %v1598_v24 = vadd.f32 %v1856_v22, %v1597_v23  ;;  %v2010_v25 = vpop.f32.mrb[15].mxu1 }
 0x78f   : > { %v1601_v26 = vmul.f32 0.2, %v1598_v24 }
 0x791   : > { %v1602_v0 = vmax.f32 %v1598_v24, %v1601_v26 }
 0x793   : > { %2028 = vmatmul.mubr.msk.f32.vlgmr.msra.gmra.mrb[10].mxu0 %vm1618_vm7, %v1602_v0 }
 0x866   : > { %v1688_v28 = vpop.f32.mrb[10].mxu0 }
 0x867   : > { %v1689_v29 = vadd.f32 %v1858_v27, %v1688_v28  ;;  %v2029_v30 = vpop.f32.mrb[11].mxu0 }
 0x869   : > { %v1692_v31 = vadd.f32 %v1689_v29, %v1516_v15 }
 0x86b   : > { %v1695_v32 = vsel %vm495_vm1, %v1692_v31, 0.0 }
 0x86c   : > { %1696 = vadd.xlane.f32.xlu0 %v1695_v32 }
 0x8f9   : > { %v1697_v33 = vpop.xlane.xlu0 %1696 }
 0x8fa   : > { %v1698_v34 = vmul.f32 0.03125, %v1697_v33 }
 0x8fc   : > { %v1699_v35 = vsub.f32 %v1692_v31, %v1698_v34 }
 0x8fe   : > { %v1700_v36 = vmul.f32 %v1699_v35, %v1699_v35 }
 0x900   : > { %v1701_v37 = vsel %vm495_vm1, %v1700_v36, 0.0 }
 0x901   : > { %1702 = vadd.xlane.f32.xlu0 %v1701_v37 }
 0x98e   : > { %v1703_v38 = vpop.xlane.xlu0 %1702 }
 0x98f   : > { %v1704_v39 = vmul.f32 0.03125, %v1703_v38 }
 0x991   : > { %v1705_v40 = vadd.f32 1e-05, %v1704_v39 }
 0x993   : > { %2169 = vrsqrt.f32 %v1705_v40 }
 0x99d   : > { %v2170_v41 = vpop.eup %2169 }
 0x99e   : > { %v1707_v43 = vmul.f32 %v2170_v41, %v1699_v35 }
 0x9a0   : > { %v1714_v45 = vmul.f32 %v1860_v42, %v1707_v43 }
 0x9a2   : > { %v1721_v46 = vadd.f32 %v1861_v44, %v1714_v45 }
 0x9a4   : > { %1722 = vst.msk [vmem:[%s489_s15] sm:$0xff] %vm495_vm1, %v1721_v46 }
 0x9a5   : > { %2280 = shalt.err (!%p2277_p5)
}
 0x9a6   : > { %s2281_s20 = scalar_lea.hbm %s2816_s2, 128  ;;  %s2285_s27 = scalar_lea.hbm %s2905_s1, 256 }
 0x9a7   : > { %p2282_p2 = scmp.ne.s32.totalorder %s2816_s2, %s2281_s20  ;;  %p2286_p7 = scmp.lt.u32.totalorder %s2816_s2, %s2905_s1 }
 0x9a8   : > { %p2287_p8 = scmp.lt.u32.totalorder %s2285_s27, %s2281_s20  ;;  %p2289_p0 = scmp.lt.u32.totalorder %s2281_s20, %s2816_s2 }
 0x9a9   : > { %p2283_p9 = pnand %p2282_p2, %p2906_p3 }
 0x9aa   : > { %p2288_p11 = por %p2287_p8, %p2286_p7 }
 0x9ab   : > { %p2284_p13 = pneg %p2283_p9 }
 0x9ac   : > { %p2290_p4 = por %p2289_p0, %p2288_p11 }
 0x9ae   : > { %p2291_p6 = pnand %p2290_p4, %p2284_p13 }
 0x9b0   : > { %2294 = shalt.err (!%p2291_p6)
}
 0x9b1   : > { %2082 = dma.vmem_to_hbm [thread:$0]  (%p2906_p3), %s2818_s29, 128, %s2816_s2, %s1724_s30  }
 0x9b2 PF: > { %s2907_s16 = sld [smem:[#allocation16_spill]]  ;;  %s2908_s28 = sld [smem:[#allocation17_spill]] }
 0x9b3   : > { %p2910_p12 = scmp.ge.s32.totalorder %s2339_s26, 2 }
 0x9b8   : > { %s1749_s18 = sand.u32 1, %s2907_s16   ;;  %p2909_p10 = scmp.ne.s32.totalorder %s2908_s28, 0 }
 0x9b9   : > { %s1750_s0 = scalar_lea.sflag [#allocation7], %s1749_s18 }
 0x9ba   : > { %p2096_p1 = pnand %p2910_p12, %p2909_p10 }
 0x9bc   : > { %2322 = dma.done.wait (!%p2096_p1), %s1750_s0, 128  }
 0x9bd   : > { %2324 = vsyncadd (!%p2096_p1), %s1750_s0, 4294967168  ;;  %p32_p5 = scmp.ge.s32.totalorder %s2554_s14, 4   ;;  %s2911_s23 = smov %s2331_s24 }
 0x9be   : > { %s2912_s24 = smov %s2335_s25  ;;  %s2913_s25 = smov %s2570_s22 }
 0x9bf   : > { %s2914_s26 = smov %s2554_s14  ;;  %34 = sbr.rel (!%p32_p5) target bundleno = 19 (0x13), region = 125 }
 0x9c6   :  { %1755 = vsyncpa [#allocation6], 1 }
 0x9c7   :  { %1757 = vsyncpa [#allocation6 + $0x1], 1 }
 0x9c8   :  { %1758 = vsyncpa [#allocation9], 1 }
 0x9c9   :  { %1759 = vsyncpa [#allocation7], 1 }
 0x9ca   :  { %1761 = vsyncpa [#allocation7 + $0x1], 1 }

</bundles_post_ra>
